<compile_context>
chip_gen: v6e
topology: v6e:2x2x1
jax: 0.10.0
libtpu: 0.0.40
codegen_flags: <defaults>
</compile_context>

<pallas_src>
import jax
import jax.numpy as jnp
from jax.experimental import pallas as pl
from jax.experimental.pallas import tpu as pltpu


def _pad_to(n, m):
    return ((n + m - 1) // m) * m


# --------------------------------------------------------------------------
# Pallas kernel 1: tiled MXU matmul with fused bias (bf16 in, f32 accumulate)
# --------------------------------------------------------------------------
def _matmul_bias_kernel(a_ref, b_ref, bias_ref, o_ref, acc_ref):
    @pl.when(pl.program_id(2) == 0)
    def _():
        acc_ref[...] = jnp.zeros_like(acc_ref)

    acc_ref[...] += jnp.dot(a_ref[...], b_ref[...],
                            preferred_element_type=jnp.float32)

    @pl.when(pl.program_id(2) == pl.num_programs(2) - 1)
    def _():
        o_ref[...] = (acc_ref[...] + bias_ref[...]).astype(o_ref.dtype)


def pallas_matmul(a, b, bias=None):
    """(M,K) @ (K,N) + bias -> (M,N) f32."""
    M, K = a.shape
    K2, N = b.shape
    assert K == K2
    a = a.astype(jnp.bfloat16)
    b = b.astype(jnp.bfloat16)
    if bias is None:
        bias = jnp.zeros((N,), jnp.float32)
    bias = bias.astype(jnp.float32)

    tm = 256 if M >= 256 else _pad_to(M, 16)
    Mp = _pad_to(M, tm)
    Kp = _pad_to(K, 128)
    if Kp <= 1280:
        tk = Kp                        # single K step; B block stays resident
    else:
        tk = max(t for t in (1024, 896, 768, 640, 512, 384, 256, 128)
                 if Kp % t == 0)
    Np = _pad_to(N, 128)
    tn = 256 if Np % 256 == 0 else 128

    ap = a if (Mp == M and Kp == K) else jnp.pad(a, ((0, Mp - M), (0, Kp - K)))
    bp = b if (Kp == K and Np == N) else jnp.pad(b, ((0, Kp - K), (0, Np - N)))
    biasp = (bias if Np == N else jnp.pad(bias, (0, Np - N))).reshape(1, Np)

    out = pl.pallas_call(
        _matmul_bias_kernel,
        out_shape=jax.ShapeDtypeStruct((Mp, Np), jnp.float32),
        grid_spec=pltpu.PrefetchScalarGridSpec(
            num_scalar_prefetch=0,
            grid=(Mp // tm, Np // tn, Kp // tk),
            in_specs=[pl.BlockSpec((tm, tk), lambda i, j, k: (i, k)),
                      pl.BlockSpec((tk, tn), lambda i, j, k: (k, j)),
                      pl.BlockSpec((1, tn), lambda i, j, k: (0, j))],
            out_specs=pl.BlockSpec((tm, tn), lambda i, j, k: (i, j)),
            scratch_shapes=[pltpu.VMEM((tm, tn), jnp.float32)]),
        compiler_params=pltpu.CompilerParams(
            dimension_semantics=("parallel", "parallel", "arbitrary")),
    )(ap, bp, biasp)
    if Mp != M or Np != N:
        out = out[:M, :N]
    return out


# --------------------------------------------------------------------------
# Pallas kernel 2: fused attention  softmax(Q K^T) V  with online softmax
# --------------------------------------------------------------------------
def _flash_attn_kernel(q_ref, k_ref, v_ref, o_ref, m_sc, l_sc, acc_sc):
    kv = pl.program_id(1)

    @pl.when(kv == 0)
    def _():
        m_sc[...] = jnp.full_like(m_sc, -jnp.inf)
        l_sc[...] = jnp.zeros_like(l_sc)
        acc_sc[...] = jnp.zeros_like(acc_sc)

    # q: (tq, dk), k: (dk, tkv), v: (tkv, dv)
    s = jnp.dot(q_ref[...], k_ref[...], preferred_element_type=jnp.float32)
    m_new = jnp.maximum(m_sc[...], jnp.max(s, axis=-1, keepdims=True))
    alpha = jnp.exp(m_sc[...] - m_new)
    p = jnp.exp(s - m_new)
    l_sc[...] = alpha * l_sc[...] + jnp.sum(p, axis=-1, keepdims=True)
    acc_sc[...] = alpha * acc_sc[...] + jnp.dot(
        p.astype(v_ref.dtype), v_ref[...], preferred_element_type=jnp.float32)
    m_sc[...] = m_new

    @pl.when(kv == pl.num_programs(1) - 1)
    def _():
        o_ref[...] = (acc_sc[...] / l_sc[...]).astype(o_ref.dtype)


def flash_attention(q, kT, v, tq=256, tkv=512):
    """q:(N,dk), kT:(dk,N), v:(N,dv) -> softmax(q@kT, axis=-1) @ v, f32."""
    N, dk = q.shape
    dv = v.shape[1]
    assert N % tq == 0 and N % tkv == 0
    q = q.astype(jnp.bfloat16)
    kT = kT.astype(jnp.bfloat16)
    v = v.astype(jnp.bfloat16)
    return pl.pallas_call(
        _flash_attn_kernel,
        out_shape=jax.ShapeDtypeStruct((N, dv), jnp.float32),
        grid_spec=pltpu.PrefetchScalarGridSpec(
            num_scalar_prefetch=0,
            grid=(N // tq, N // tkv),
            in_specs=[pl.BlockSpec((tq, dk), lambda qi, ki: (qi, 0)),
                      pl.BlockSpec((dk, tkv), lambda qi, ki: (0, ki)),
                      pl.BlockSpec((tkv, dv), lambda qi, ki: (ki, 0))],
            out_specs=pl.BlockSpec((tq, dv), lambda qi, ki: (qi, 0)),
            scratch_shapes=[pltpu.VMEM((tq, 1), jnp.float32),
                            pltpu.VMEM((tq, 1), jnp.float32),
                            pltpu.VMEM((tq, dv), jnp.float32)]),
        compiler_params=pltpu.CompilerParams(
            dimension_semantics=("parallel", "arbitrary")),
    )(q, kT, v)


# --------------------------------------------------------------------------
# Conv / ConvTranspose via NHWC im2col + Pallas matmul
# --------------------------------------------------------------------------
def conv2d(x, w, b=None, stride=1, padding=0):
    """x: (B,H,W,C) NHWC, w: (Cout,Cin,kh,kw) (PyTorch layout)."""
    B, H, W, C = x.shape
    Cout, Cin, kh, kw = w.shape
    assert Cin == C
    x = x.astype(jnp.bfloat16)
    if padding:
        x = jnp.pad(x, ((0, 0), (padding, padding), (padding, padding), (0, 0)))
    Ho = (H + 2 * padding - kh) // stride + 1
    Wo = (W + 2 * padding - kw) // stride + 1
    # TODO(synk): im2col is still materialized in HBM (not fused into the
    # matmul kernel); NHWC keeps it a cheap bf16 slice+concat.
    cols = [x[:, i:i + (Ho - 1) * stride + 1:stride,
              j:j + (Wo - 1) * stride + 1:stride, :]
            for i in range(kh) for j in range(kw)]
    patches = jnp.concatenate(cols, axis=-1).reshape(B * Ho * Wo, kh * kw * C)
    wm = jnp.transpose(w, (2, 3, 1, 0)).reshape(kh * kw * Cin, Cout)
    out = pallas_matmul(patches, wm, bias=b)
    return out.reshape(B, Ho, Wo, Cout)


# phase a (output row parity), patch row offset dr -> kernel tap kh
_CT_TAP = {0: {0: 3, 1: 1}, 1: {1: 2, 2: 0}}


def conv_transpose2d(x, w, b=None):
    """ConvTranspose2d(k=4, s=2, p=1) in NHWC as one dense matmul.
    x: (B,H,W,Cin), w: (Cin,Cout,4,4) (PyTorch layout) -> (B,2H,2W,Cout)."""
    B, H, W, C = x.shape
    Cin, Cout = w.shape[0], w.shape[1]
    assert Cin == C and w.shape[2:] == (4, 4)
    xp = jnp.pad(x.astype(jnp.bfloat16), ((0, 0), (1, 1), (1, 1), (0, 0)))
    cols = [xp[:, dr:dr + H, dc:dc + W, :] for dr in range(3) for dc in range(3)]
    patches = jnp.concatenate(cols, axis=-1).reshape(B * H * W, 9 * C)
    # Each of the 4 output phases uses 4 of the 9 taps -> 2.25x MXU work
    # instead of 4x for zero-stuffed upsampling.
    wb = w.astype(jnp.bfloat16)
    weff = jnp.zeros((3, 3, Cin, 2, 2, Cout), jnp.bfloat16)
    for a in range(2):
        for dr, kh_ in _CT_TAP[a].items():
            for bb in range(2):
                for dc, kw_ in _CT_TAP[bb].items():
                    weff = weff.at[dr, dc, :, a, bb, :].set(wb[:, :, kh_, kw_])
    weff = weff.reshape(9 * Cin, 4 * Cout)
    bias4 = None if b is None else jnp.tile(b, 4)
    out = pallas_matmul(patches, weff, bias=bias4)           # (B*H*W, 4*Cout)
    out = out.reshape(B, H, W, 2, 2, Cout)
    return out.transpose(0, 1, 3, 2, 4, 5).reshape(B, 2 * H, 2 * W, Cout)


# --------------------------------------------------------------------------
# Norms / activations (glue, NHWC)
# --------------------------------------------------------------------------
def batchnorm2d(x, bn, eps=1e-5):
    mean = jnp.mean(x, axis=(0, 1, 2), keepdims=True)
    var = jnp.var(x, axis=(0, 1, 2), keepdims=True)
    xn = (x - mean) * jax.lax.rsqrt(var + eps)
    return xn * bn['gamma'] + bn['beta']


def instancenorm2d(x, eps=1e-5):
    mean = jnp.mean(x, axis=(1, 2), keepdims=True)
    var = jnp.var(x, axis=(1, 2), keepdims=True)
    return (x - mean) * jax.lax.rsqrt(var + eps)


def relu(x):
    return jnp.maximum(x, 0.0)


def leaky_relu(x, slope=0.2):
    return jnp.where(x >= 0, x, slope * x)


# --------------------------------------------------------------------------
# Module forwards (NHWC)
# --------------------------------------------------------------------------
def residual_block(p, x, is_bn=True):
    res = x
    out = conv2d(x, p['conv1']['w'], None, stride=1, padding=1)
    if is_bn:
        out = batchnorm2d(out, p['bn1'])
    out = relu(out)
    out = conv2d(out, p['conv2']['w'], None, stride=1, padding=1)
    if is_bn:
        out = batchnorm2d(out, p['bn2'])
    return relu(out + res)


def self_attn(p, x):
    B, H, W, C = x.shape
    N = H * W
    c8 = C // 8
    wq = p['q']['w'].reshape(c8, C).T
    wk = p['k']['w'].reshape(c8, C).T
    wv = p['v']['w'].reshape(C, C).T
    wqkv = jnp.concatenate([wq, wk, wv], axis=1)              # (C, 2*c8+C)
    bqkv = jnp.concatenate([p['q']['b'], p['k']['b'], p['v']['b']])
    x2 = x.reshape(B, N, C)
    outs = []
    for bi in range(B):
        qkv = pallas_matmul(x2[bi], wqkv, bias=bqkv)          # fused q/k/v conv
        q = qkv[:, :c8]
        kT = qkv[:, c8:2 * c8].T
        v = qkv[:, 2 * c8:]
        outs.append(flash_attention(q, kT, v))
    out = jnp.stack(outs).reshape(B, H, W, C)
    return p['gamma'] * out + x


def trans_attn(p, x, y):
    out_1 = instancenorm2d(self_attn(p['sa1'], x))
    out_2 = conv2d(out_1, p['conv1']['w'], p['conv1']['b'], stride=1, padding=1)
    out_2 = instancenorm2d(out_1 + out_2)
    out_3 = instancenorm2d(self_attn(p['sa2'], y))
    B, H, W, C = out_2.shape
    N = H * W
    c8 = C // 8
    wqk = jnp.concatenate([p['q']['w'].reshape(c8, C).T,
                           p['k']['w'].reshape(c8, C).T], axis=1)
    bqk = jnp.concatenate([p['q']['b'], p['k']['b']])
    wv = p['v']['w'].reshape(C, C).T
    o2 = out_2.reshape(B, N, C)
    o3 = out_3.reshape(B, N, C)
    outs = []
    for bi in range(B):
        qk = pallas_matmul(o2[bi], wqk, bias=bqk)
        v = pallas_matmul(o3[bi], wv, bias=p['v']['b'])
        outs.append(flash_attention(qk[:, :c8], qk[:, c8:].T, v))
    out = jnp.stack(outs).reshape(B, H, W, C)
    out = p['gamma'] * out + y
    out = instancenorm2d(out)
    out = instancenorm2d(out + out_3)
    out_4 = conv2d(out, p['conv2']['w'], p['conv2']['b'], stride=1, padding=1)
    return instancenorm2d(out + out_4)


def spacial_attn(p, x, y):
    xy = jnp.concatenate([x, y], axis=-1)
    gate = jax.nn.sigmoid(
        conv2d(xy, p['conv']['w'], p['conv']['b'], stride=1, padding=1))
    return x * (1.0 - gate), y * gate


# --------------------------------------------------------------------------
# Per-layer jitted blocks (shape-based caching: 24 resblocks -> 1 compile etc.)
# --------------------------------------------------------------------------
@jax.jit
def enc_first(p, x):                   # Conv(k4,s2,p1) + LeakyReLU
    return leaky_relu(conv2d(x, p['w'], p['b'], stride=2, padding=1))


@jax.jit
def enc_block(p, x):                   # Conv(k4,s2,p1) + BN + LeakyReLU
    return leaky_relu(batchnorm2d(
        conv2d(x, p['conv']['w'], p['conv']['b'], stride=2, padding=1), p['bn']))


@jax.jit
def enc_last(p, x):                    # en8: Conv(k4,s2,p1) + ReLU
    return relu(conv2d(x, p['conv']['w'], p['conv']['b'], stride=2, padding=1))


@jax.jit
def en_2_block(p, x):                  # Conv(k3,s1,p1) + BN + LeakyReLU
    return leaky_relu(batchnorm2d(
        conv2d(x, p['conv']['w'], p['conv']['b'], stride=1, padding=1), p['bn']))


@jax.jit
def dec_block(p, x):                   # ConvT + BN + ReLU (Dropout = identity)
    return relu(batchnorm2d(
        conv_transpose2d(x, p['conv']['w'], p['conv']['b']), p['bn']))


@jax.jit
def dec_last(p, x):                    # de8: ConvT + Tanh
    return jnp.tanh(conv_transpose2d(x, p['conv']['w'], p['conv']['b']))


residual_block_jit = jax.jit(residual_block, static_argnames=('is_bn',))
trans_attn_jit = jax.jit(trans_attn)
spacial_attn_jit = jax.jit(spacial_attn)


# --------------------------------------------------------------------------
# Deterministic parameter init (PyTorch weight layouts)
# --------------------------------------------------------------------------
class Init:
    def __init__(self, seed=0):
        self._key = jax.random.PRNGKey(seed)

    def key(self):
        self._key, k = jax.random.split(self._key)
        return k


def conv_p(init, cin, cout, k, bias=True):
    fan_in = float(cin * k * k)
    w = jax.random.normal(init.key(), (cout, cin, k, k), jnp.float32) / jnp.sqrt(fan_in)
    return {'w': w, 'b': jnp.zeros((cout,), jnp.float32) if bias else None}


def convT_p(init, cin, cout, k):
    fan_in = float(cin * k * k)
    w = jax.random.normal(init.key(), (cin, cout, k, k), jnp.float32) / jnp.sqrt(fan_in)
    return {'w': w, 'b': jnp.zeros((cout,), jnp.float32)}


def bn_p(c):
    return {'gamma': jnp.ones((c,), jnp.float32), 'beta': jnp.zeros((c,), jnp.float32)}


def resblock_p(init, cin, cout):
    return {'conv1': conv_p(init, cin, cout, 3, bias=False), 'bn1': bn_p(cout),
            'conv2': conv_p(init, cout, cout, 3, bias=False), 'bn2': bn_p(cout)}


def self_attn_p(init, c):
    return {'q': conv_p(init, c, c // 8, 1), 'k': conv_p(init, c, c // 8, 1),
            'v': conv_p(init, c, c, 1), 'gamma': jnp.zeros((1,), jnp.float32)}


def trans_attn_p(init, c):
    return {'sa1': self_attn_p(init, c), 'conv1': conv_p(init, c, c, 3),
            'sa2': self_attn_p(init, c), 'conv2': conv_p(init, c, c, 3),
            'q': conv_p(init, c, c // 8, 1), 'k': conv_p(init, c, c // 8, 1),
            'v': conv_p(init, c, c, 1), 'gamma': jnp.zeros((1,), jnp.float32)}


def spacial_attn_p(init, c):
    return {'conv': conv_p(init, 2 * c, 1, 3)}


def sys_generator_p(init, input_nc, output_nc, ngf=64):
    P = {}
    P['en_1'] = conv_p(init, input_nc, ngf, 4)
    P['en_2'] = {'conv': conv_p(init, ngf, ngf * 2, 3), 'bn': bn_p(ngf * 2)}
    P['resblock'] = [resblock_p(init, ngf * 2, ngf * 2) for _ in range(3)]
    P['resblock_2'] = [resblock_p(init, ngf * 2, ngf * 2) for _ in range(3)]
    P['resblock_1'] = [resblock_p(init, ngf * 2, ngf * 2) for _ in range(6)]
    P['resblock1'] = resblock_p(init, 512, 512)
    P['resblock2'] = resblock_p(init, 512, 512)
    P['resblock3'] = resblock_p(init, 512, 512)
    P['en1'] = conv_p(init, input_nc, ngf, 4)
    P['en2'] = {'conv': conv_p(init, ngf, ngf * 2, 4), 'bn': bn_p(ngf * 2)}
    P['en3'] = {'conv': conv_p(init, ngf * 2, ngf * 4, 4), 'bn': bn_p(ngf * 4)}
    P['en4'] = {'conv': conv_p(init, ngf * 4, ngf * 8, 4), 'bn': bn_p(ngf * 8)}
    P['en5'] = {'conv': conv_p(init, ngf * 8, ngf * 8, 4), 'bn': bn_p(ngf * 8)}
    P['en6'] = {'conv': conv_p(init, ngf * 8, ngf * 8, 4), 'bn': bn_p(ngf * 8)}
    P['en7'] = {'conv': conv_p(init, ngf * 8, ngf * 8, 4), 'bn': bn_p(ngf * 8)}
    P['en8'] = {'conv': conv_p(init, ngf * 8, ngf * 8, 4)}
    P['de1'] = {'conv': convT_p(init, ngf * 8, ngf * 8, 4), 'bn': bn_p(ngf * 8)}
    P['de2'] = {'conv': convT_p(init, ngf * 16, ngf * 8, 4), 'bn': bn_p(ngf * 8)}
    P['de3'] = {'conv': convT_p(init, ngf * 16, ngf * 8, 4), 'bn': bn_p(ngf * 8)}
    P['de4'] = {'conv': convT_p(init, ngf * 16, ngf * 8, 4), 'bn': bn_p(ngf * 8)}
    P['de5'] = {'conv': convT_p(init, ngf * 16, ngf * 4, 4), 'bn': bn_p(ngf * 4)}
    P['de6'] = {'conv': convT_p(init, ngf * 8, ngf * 2, 4), 'bn': bn_p(ngf * 2)}
    P['de7'] = {'conv': convT_p(init, ngf * 4, ngf, 4), 'bn': bn_p(ngf)}
    P['de8'] = {'conv': convT_p(init, ngf * 2, output_nc, 4)}
    P['de8_1'] = {'conv': convT_p(init, ngf * 2, output_nc, 4)}  # unused in forward
    P['ta6'] = trans_attn_p(init, ngf * 2)
    P['sp'] = spacial_attn_p(init, ngf * 2)
    return P


# --------------------------------------------------------------------------
# Full Sys_Generator forward (orchestration; NCHW in/out, NHWC internally)
# --------------------------------------------------------------------------
def sys_generator_forward(P, x_nchw):
    x = jnp.transpose(x_nchw, (0, 2, 3, 1))

    e1 = enc_first(P['en1'], x)
    e2 = enc_block(P['en2'], e1)
    e3 = enc_block(P['en3'], e2)
    e4 = enc_block(P['en4'], e3)
    e5 = enc_block(P['en5'], e4)
    e6 = enc_block(P['en6'], e5)
    e7 = enc_block(P['en7'], e6)
    e8 = enc_last(P['en8'], e7)

    e8 = residual_block_jit(P['resblock1'], e8, is_bn=False)
    e8 = residual_block_jit(P['resblock2'], e8, is_bn=False)
    e8 = residual_block_jit(P['resblock3'], e8, is_bn=False)

    # TODO(synk): nn.Dropout(0.5) in de2-de4 is stochastic train-mode masking;
    # eval-mode identity is used here.
    d1 = jnp.concatenate([dec_block(P['de1'], e8), e7], axis=-1)
    d2 = jnp.concatenate([dec_block(P['de2'], d1), e6], axis=-1)
    d3 = jnp.concatenate([dec_block(P['de3'], d2), e5], axis=-1)
    d4 = jnp.concatenate([dec_block(P['de4'], d3), e4], axis=-1)
    d5 = jnp.concatenate([dec_block(P['de5'], d4), e3], axis=-1)
    d6 = dec_block(P['de6'], d5)
    d6 = jnp.concatenate([trans_attn_jit(P['ta6'], e2, d6), e2], axis=-1)
    d7 = jnp.concatenate([dec_block(P['de7'], d6), e1], axis=-1)

    o1 = enc_first(P['en_1'], x)
    o1 = en_2_block(P['en_2'], o1)
    for bp in P['resblock_2']:
        o1 = residual_block_jit(bp, o1, is_bn=True)

    o1, d7 = spacial_attn_jit(P['sp'], o1, d7)
    o1 = o1 + d7
    for bp in P['resblock']:
        o1 = residual_block_jit(bp, o1, is_bn=True)
    for bp in P['resblock_1']:
        o1 = residual_block_jit(bp, o1, is_bn=True)

    d8 = dec_last(P['de8'], o1)
    return jnp.transpose(d8, (0, 3, 1, 2))


# --------------------------------------------------------------------------
if __name__ == "__main__":
    # ngf=64 is required by the hard-coded ResidualBlock(512,512); eight
    # stride-2 encoders require spatial >= 256.  Batch=1 keeps it small.
    input_nc, output_nc, ngf = 3, 3, 64
    B, H, W = 1, 256, 256

    x = jax.random.normal(jax.random.PRNGKey(0), (B, input_nc, H, W), jnp.float32)
    params = sys_generator_p(Init(0), input_nc, output_nc, ngf)

    out = sys_generator_forward(params, x)
    out = jax.block_until_ready(out)

    assert out.shape == (B, output_nc, H, W), out.shape
    assert bool(jnp.isfinite(out).all())
    print("KERNEL_OK")
</pallas_src>

<mosaic_0001>
module attributes {stable_mosaic.version = 11 : i64} {
  func.func @_matmul_bias_kernel(%arg0: i32, %arg1: i32, %arg2: i32, %arg3: memref<256x128xbf16, #tpu.memory_space<vmem>>, %arg4: memref<128x128xbf16, #tpu.memory_space<vmem>>, %arg5: memref<1x128xf32, #tpu.memory_space<vmem>>, %arg6: memref<256x128xf32, #tpu.memory_space<vmem>>, %arg7: memref<256x128xf32, #tpu.memory_space<vmem>>) attributes {dimension_semantics = [#tpu.dimension_semantics<parallel>, #tpu.dimension_semantics<parallel>, #tpu.dimension_semantics<arbitrary>], iteration_bounds = array<i64: 64, 1, 1>, scalar_prefetch = 0 : i64, scratch_operands = 1 : i64, tpu.core_type = #tpu.core_type<tc>, window_params = [{transform_indices = @transform_0, window_bounds = array<i64: 256, 128>}, {transform_indices = @transform_1, window_bounds = array<i64: 128, 128>}, {transform_indices = @transform_2, window_bounds = array<i64: 1, 128>}, {transform_indices = @transform_3, window_bounds = array<i64: 256, 128>}]} {
    %c0_i32 = arith.constant 0 : i32
    %0 = arith.cmpi eq, %arg2, %c0_i32 : i32
    %1 = arith.extui %0 : i1 to i32
    %c0_i32_0 = arith.constant 0 : i32
    %2 = arith.cmpi ne, %1, %c0_i32_0 : i32
    scf.if %2 {
      %cst_10 = arith.constant 0.000000e+00 : f32
      %12 = vector.broadcast %cst_10 : f32 to vector<256x128xf32>
      %c0_11 = arith.constant 0 : index
      %c0_12 = arith.constant 0 : index
      %13 = vector.load %arg7[%c0_11, %c0_12] : memref<256x128xf32, #tpu.memory_space<vmem>>, vector<256x128xf32>
      tpu.vector_store %arg7[%c0_11, %c0_12], %12 {strides = array<i32>} : memref<256x128xf32, #tpu.memory_space<vmem>>, vector<256x128xf32>,
    } else {
    }
    %c0 = arith.constant 0 : index
    %c0_1 = arith.constant 0 : index
    %3 = vector.load %arg7[%c0, %c0_1] : memref<256x128xf32, #tpu.memory_space<vmem>>, vector<256x128xf32>
    %c0_2 = arith.constant 0 : index
    %c0_3 = arith.constant 0 : index
    %4 = vector.load %arg3[%c0_2, %c0_3] : memref<256x128xbf16, #tpu.memory_space<vmem>>, vector<256x128xbf16>
    %c0_4 = arith.constant 0 : index
    %c0_5 = arith.constant 0 : index
    %5 = vector.load %arg4[%c0_4, %c0_5] : memref<128x128xbf16, #tpu.memory_space<vmem>>, vector<128x128xbf16>
    %cst = arith.constant dense<0.000000e+00> : vector<256x128xf32>
    %6 = tpu.matmul %4, %5, %cst {dimension_numbers = #tpu.dot_dimension_numbers<[1], [0], [0], [1], [0, 0, 1, 1], [], []>} : vector<256x128xbf16>, vector<128x128xbf16>, vector<256x128xf32> -> vector<256x128xf32>
    %7 = arith.addf %3, %6 : vector<256x128xf32>
    %c0_6 = arith.constant 0 : index
    %c0_7 = arith.constant 0 : index
    %8 = vector.load %arg7[%c0_6, %c0_7] : memref<256x128xf32, #tpu.memory_space<vmem>>, vector<256x128xf32>
    tpu.vector_store %arg7[%c0_6, %c0_7], %7 {strides = array<i32>} : memref<256x128xf32, #tpu.memory_space<vmem>>, vector<256x128xf32>,
    %c0_i32_8 = arith.constant 0 : i32
    %9 = arith.cmpi eq, %arg2, %c0_i32_8 : i32
    %10 = arith.extui %9 : i1 to i32
    %c0_i32_9 = arith.constant 0 : i32
    %11 = arith.cmpi ne, %10, %c0_i32_9 : i32
    scf.if %11 {
      %c0_10 = arith.constant 0 : index
      %c0_11 = arith.constant 0 : index
      %12 = vector.load %arg7[%c0_10, %c0_11] : memref<256x128xf32, #tpu.memory_space<vmem>>, vector<256x128xf32>
      %c0_12 = arith.constant 0 : index
      %c0_13 = arith.constant 0 : index
      %13 = vector.load %arg5[%c0_12, %c0_13] : memref<1x128xf32, #tpu.memory_space<vmem>>, vector<1x128xf32>
      %14 = vector.broadcast %13 : vector<1x128xf32> to vector<256x128xf32>
      %15 = arith.addf %12, %14 : vector<256x128xf32>
      %c0_14 = arith.constant 0 : index
      %c0_15 = arith.constant 0 : index
      %16 = vector.load %arg6[%c0_14, %c0_15] : memref<256x128xf32, #tpu.memory_space<vmem>>, vector<256x128xf32>
      tpu.vector_store %arg6[%c0_14, %c0_15], %15 {strides = array<i32>} : memref<256x128xf32, #tpu.memory_space<vmem>>, vector<256x128xf32>,
    } else {
    }
    return
  }
  func.func @transform_0(%arg0: i32, %arg1: i32, %arg2: i32) -> (i32, i32) {
    %c0_i32 = arith.constant 0 : i32
    return %arg0, %arg2 : i32, i32
  }
  func.func @transform_1(%arg0: i32, %arg1: i32, %arg2: i32) -> (i32, i32) {
    %c0_i32 = arith.constant 0 : i32
    return %arg2, %arg1 : i32, i32
  }
  func.func @transform_2(%arg0: i32, %arg1: i32, %arg2: i32) -> (i32, i32) {
    %c0_i32 = arith.constant 0 : i32
    %c0_i32_0 = arith.constant 0 : i32
    return %c0_i32, %arg1 : i32, i32
  }
  func.func @transform_3(%arg0: i32, %arg1: i32, %arg2: i32) -> (i32, i32) {
    %c0_i32 = arith.constant 0 : i32
    return %arg0, %arg1 : i32, i32
  }
}

</mosaic_0001>

<bundles_post_ra>
// kernel: enc_first.1
= control target key start
LH: loop header
LB: loop body
LE: loop exit
PB: predicated region body
PF: predicated region fallthrough
CT: control target
= control target key end

     0   :  { %s1180_s12 = smov 0   ;;  %s1182_s13 = smov 0   ;;  %s1330_s0 = inlined_call_operand.vmem [shape: bf16[16384,128], index: 0, kind: input, shape index: {}]   ;;  %s1331_s1 = inlined_call_operand.vmem [shape: bf16[128,128], index: 1, kind: input, shape index: {}]   ;;  %s1332_s2 = inlined_call_operand.vmem [shape: f32[1,128], index: 2, kind: input, shape index: {}]   ;;  %s1333_s3 = inlined_call_operand.vmem [shape: f32[16384,128], index: 3, kind: output, shape index: {}]  }
   0x1   :  { %s1184_s14 = smov 0  }
   0x2 LB: > { %s32_s15 = sadd.s32 1, %s1154_s13  ;;  %p968_p0 = scmp.ge.s32.totalorder %s1158_s14, 1  ;;  %s1158_s14 = sphi %s1184_s14, %s13_s14   ;;  %s1154_s13 = sphi %s1182_s13, %s1335_s13   ;;  %s1150_s12 = sphi %s1180_s12, %s1334_s12  }
   0x3   : > { %p34_p1 = scmp.ge.s32.totalorder %s32_s15, 64  ;;  %p188_p2 = scmp.lt.s32.totalorder %s1158_s14, 65 }
   0x5   : > { %s1337_s15 = smov (%p34_p1, %s32_s15), 0  ;;  %p189_p3 = pnand %p968_p0, %p188_p2 }
   0x6   : > { %s969_s18 = sshll.u32 (!%p189_p3), %s1150_s12, 5 }
   0x7   : > { %192 = sbr.rel (%p189_p3) target bundleno = 271 (0x10f), region = 32  ;;  %p230_p4 = scmp.lt.s32.totalorder (!%p189_p3), %s969_s18, 2047 }
   0xc   : > { %v1112_v0 = vld [vmem:[%s1331_s1 + $0x38] sm:$0xff]   ;;  %v1113_v1 = vld [vmem:[%s1331_s1 + $0x30] sm:$0xff]   ;;  %s1339_s18 = smov (!%p230_p4, %s969_s18), 2047  ;;  %v1114_v2 = vld [vmem:[%s1331_s1 + $0x28] sm:$0xff]  }
   0xd   : > { %1024 = vmatprep.subr.bf16.mxu0 %v1112_v0  ;;  %1072 = vmatprep.subr.bf16.mxu1 %v1112_v0  ;;  %s970_s23 = sshll.u32 %s1339_s18, 2  ;;  %v1115_v3 = vld [vmem:[%s1331_s1 + $0x20] sm:$0xff]   ;;  %v1116_v6 = vld [vmem:[%s1331_s1 + $0x18] sm:$0xff]   ;;  %v1117_v7 = vld [vmem:[%s1331_s1 + $0x10] sm:$0xff]   ;;  %s972_s10 = sshll.u32 %s1339_s18, 3 }
   0xe   : > { %1025 = vmatpush3.bf16.msra.mxu0 %v1112_v0  ;;  %1080 = vmatpush3.bf16.msra.mxu1 %v1112_v0  ;;  %s1213_s26 = scalar_lea.vmem %s1330_s0, %s970_s23  ;;  %v1118_v8 = vld [vmem:[%s1331_s1 + $0x8] sm:$0xff]   ;;  %v1119_v9 = vld [vmem:[%s1331_s1] sm:$0xff]   ;;  %s1255_s19 = scalar_lea.vmem %s1333_s3, %s972_s10 }
   0xf   : > { %1026 = vmatprep.subr.bf16.mxu0 %v1113_v1  ;;  %1073 = vmatprep.subr.bf16.mxu1 %v1113_v1  ;;  %v1120_v4 = vld [vmem:[%s1213_s26] sm:$0xff]   ;;  %v1122_v10 = vld [vmem:[%s1213_s26 + $0x8] sm:$0xff]   ;;  %v1124_v12 = vld [vmem:[%s1213_s26 + $0x10] sm:$0xff]  }
  0x10   : > { %v1121_v5 = vld [vmem:[%s1213_s26 + $0x40] sm:$0xff]   ;;  %1040 = vmatprep.mubr.bf16.mxu0 %v1120_v4  ;;  %v1123_v11 = vld [vmem:[%s1213_s26 + $0x48] sm:$0xff]   ;;  %v1125_v13 = vld [vmem:[%s1213_s26 + $0x50] sm:$0xff]  }
  0x11   : > { %1056 = vmatprep.mubr.bf16.mxu1 %v1121_v5  ;;  %v1126_v14 = vld [vmem:[%s1213_s26 + $0x18] sm:$0xff]   ;;  %v1128_v16 = vld [vmem:[%s1213_s26 + $0x20] sm:$0xff]   ;;  %v1130_v18 = vld [vmem:[%s1213_s26 + $0x28] sm:$0xff]  }
  0x12   : > { %1027 = vmatpush3.bf16.msra.mxu0 %v1113_v1  ;;  %1081 = vmatpush3.bf16.msra.mxu1 %v1113_v1  ;;  %v1127_v15 = vld [vmem:[%s1213_s26 + $0x58] sm:$0xff]   ;;  %v1129_v17 = vld [vmem:[%s1213_s26 + $0x60] sm:$0xff]   ;;  %v1131_v19 = vld [vmem:[%s1213_s26 + $0x68] sm:$0xff]  }
  0x13   : > { %1028 = vmatprep.subr.bf16.mxu0 %v1114_v2  ;;  %1074 = vmatprep.subr.bf16.mxu1 %v1114_v2  ;;  %v1132_v20 = vld [vmem:[%s1213_s26 + $0x30] sm:$0xff]   ;;  %v1134_v22 = vld [vmem:[%s1213_s26 + $0x38] sm:$0xff]   ;;  %v1250_v24 = vld [vmem:[%s1332_s2] ss:$0 sm:$0xff] }
  0x14   : > { %v1133_v21 = vld [vmem:[%s1213_s26 + $0x70] sm:$0xff]   ;;  %v1135_v23 = vld [vmem:[%s1213_s26 + $0x78] sm:$0xff]  }
  0x16   : > { %1029 = vmatpush3.bf16.msra.mxu0 %v1114_v2  ;;  %1082 = vmatpush3.bf16.msra.mxu1 %v1114_v2 }
  0x17   : > { %1030 = vmatprep.subr.bf16.mxu0 %v1115_v3  ;;  %1075 = vmatprep.subr.bf16.mxu1 %v1115_v3 }
  0x1a   : > { %1031 = vmatpush3.bf16.msra.mxu0 %v1115_v3  ;;  %1083 = vmatpush3.bf16.msra.mxu1 %v1115_v3 }
  0x1b   : > { %1032 = vmatprep.subr.bf16.mxu0 %v1116_v6  ;;  %1076 = vmatprep.subr.bf16.mxu1 %v1116_v6 }
  0x1e   : > { %1033 = vmatpush3.bf16.msra.mxu0 %v1116_v6  ;;  %1084 = vmatpush3.bf16.msra.mxu1 %v1116_v6 }
  0x1f   : > { %1034 = vmatprep.subr.bf16.mxu0 %v1117_v7  ;;  %1077 = vmatprep.subr.bf16.mxu1 %v1117_v7 }
  0x22   : > { %1035 = vmatpush3.bf16.msra.mxu0 %v1117_v7  ;;  %1085 = vmatpush3.bf16.msra.mxu1 %v1117_v7 }
  0x23   : > { %1036 = vmatprep.subr.bf16.mxu0 %v1118_v8  ;;  %1078 = vmatprep.subr.bf16.mxu1 %v1118_v8 }
  0x26   : > { %1037 = vmatpush3.bf16.msra.mxu0 %v1118_v8  ;;  %1086 = vmatpush3.bf16.msra.mxu1 %v1118_v8 }
  0x27   : > { %1038 = vmatprep.subr.bf16.mxu0 %v1119_v9  ;;  %1079 = vmatprep.subr.bf16.mxu1 %v1119_v9 }
  0x2a   : > { %1039 = vmatpush3.bf16.msra.mxu0 %v1119_v9  ;;  %1087 = vmatpush3.bf16.msra.mxu1 %v1119_v9 }
  0x2d   : > { %1041 = vmatmul.mubr.bf16.vlgmr.msra.gmra.mxu0 %v1122_v10  ;;  %1057 = vmatmul.mubr.bf16.vlgmr.msra.gmra.mxu1 %v1123_v11 }
  0x2e   : > { %1044 = vmatprep.mubr.bf16.mxu0 %v1124_v12  ;;  %1060 = vmatprep.mubr.bf16.mxu1 %v1125_v13 }
  0x35   : > { %1045 = vmatmul.mubr.bf16.gmra.mxu0 %v1126_v14  ;;  %1061 = vmatmul.mubr.bf16.gmra.mxu1 %v1127_v15 }
  0x36   : > { %1048 = vmatprep.mubr.bf16.mxu0 %v1128_v16  ;;  %1064 = vmatprep.mubr.bf16.mxu1 %v1129_v17 }
  0x3d   : > { %1049 = vmatmul.mubr.bf16.gmra.mxu0 %v1130_v18  ;;  %1065 = vmatmul.mubr.bf16.gmra.mxu1 %v1131_v19 }
  0x3e   : > { %1052 = vmatprep.mubr.bf16.mxu0 %v1132_v20  ;;  %1068 = vmatprep.mubr.bf16.mxu1 %v1133_v21 }
  0x45   : > { %1053 = vmatmul.mubr.bf16.gmra.mxu0 %v1134_v22  ;;  %1069 = vmatmul.mubr.bf16.gmra.mxu1 %v1135_v23 }
  0xed   : > { %v1042_v25 = vpop.f32.mrf.mxu0  ;;  %v1058_v26 = vpop.f32.mrf.mxu1 }
  0xee   : > { %v789_v27 = vadd.f32 %v1042_v25, %v1250_v24  ;;  %v805_v28 = vadd.f32 %v1058_v26, %v1250_v24 }
  0xef   : > { %v554_v29 = vpop.f32.mrf.mxu0  ;;  %v618_v30 = vpop.f32.mrf.mxu1 }
  0xf0   : > { %821 = vst [vmem:[%s1255_s19 + $0x10] sm:$0xff] %v789_v27  ;;  %837 = vst [vmem:[%s1255_s19 + $0x90] sm:$0xff] %v805_v28  ;;  %v787_v31 = vadd.f32 %v1250_v24, %v554_v29  ;;  %v803_v32 = vadd.f32 %v1250_v24, %v618_v30 }
  0xf1   : > { %v1043_v33 = vpop.f32.mrf.mxu0  ;;  %v1059_v34 = vpop.f32.mrf.mxu1 }
  0xf2   : > { %819 = vst [vmem:[%s1255_s19] sm:$0xff] %v787_v31  ;;  %835 = vst [vmem:[%s1255_s19 + $0x80] sm:$0xff] %v803_v32  ;;  %v790_v35 = vadd.f32 %v1043_v33, %v1250_v24  ;;  %v806_v36 = vadd.f32 %v1059_v34, %v1250_v24 }
  0xf3   : > { %v557_v37 = vpop.f32.mrf.mxu0  ;;  %v621_v38 = vpop.f32.mrf.mxu1 }
  0xf4   : > { %822 = vst [vmem:[%s1255_s19 + $0x18] sm:$0xff] %v790_v35  ;;  %838 = vst [vmem:[%s1255_s19 + $0x98] sm:$0xff] %v806_v36  ;;  %v788_v39 = vadd.f32 %v1250_v24, %v557_v37  ;;  %v804_v40 = vadd.f32 %v1250_v24, %v621_v38 }
  0xf5   : > { %v1046_v41 = vpop.f32.mrf.mxu0  ;;  %v1062_v42 = vpop.f32.mrf.mxu1 }
  0xf6   : > { %820 = vst [vmem:[%s1255_s19 + $0x8] sm:$0xff] %v788_v39  ;;  %836 = vst [vmem:[%s1255_s19 + $0x88] sm:$0xff] %v804_v40  ;;  %v793_v43 = vadd.f32 %v1046_v41, %v1250_v24  ;;  %v809_v44 = vadd.f32 %v1062_v42, %v1250_v24 }
  0xf7   : > { %v570_v45 = vpop.f32.mrf.mxu0  ;;  %v634_v46 = vpop.f32.mrf.mxu1 }
  0xf8   : > { %825 = vst [vmem:[%s1255_s19 + $0x30] sm:$0xff] %v793_v43  ;;  %841 = vst [vmem:[%s1255_s19 + $0xb0] sm:$0xff] %v809_v44  ;;  %v791_v47 = vadd.f32 %v1250_v24, %v570_v45  ;;  %v807_v48 = vadd.f32 %v1250_v24, %v634_v46 }
  0xf9   : > { %v1047_v49 = vpop.f32.mrf.mxu0  ;;  %v1063_v50 = vpop.f32.mrf.mxu1 }
  0xfa   : > { %823 = vst [vmem:[%s1255_s19 + $0x20] sm:$0xff] %v791_v47  ;;  %839 = vst [vmem:[%s1255_s19 + $0xa0] sm:$0xff] %v807_v48  ;;  %v794_v51 = vadd.f32 %v1047_v49, %v1250_v24  ;;  %v810_v52 = vadd.f32 %v1063_v50, %v1250_v24 }
  0xfb   : > { %v573_v53 = vpop.f32.mrf.mxu0  ;;  %v637_v54 = vpop.f32.mrf.mxu1 }
  0xfc   : > { %826 = vst [vmem:[%s1255_s19 + $0x38] sm:$0xff] %v794_v51  ;;  %842 = vst [vmem:[%s1255_s19 + $0xb8] sm:$0xff] %v810_v52  ;;  %v792_v55 = vadd.f32 %v1250_v24, %v573_v53  ;;  %v808_v56 = vadd.f32 %v1250_v24, %v637_v54 }
  0xfd   : > { %v1050_v57 = vpop.f32.mrf.mxu0  ;;  %v1066_v58 = vpop.f32.mrf.mxu1 }
  0xfe   : > { %824 = vst [vmem:[%s1255_s19 + $0x28] sm:$0xff] %v792_v55  ;;  %840 = vst [vmem:[%s1255_s19 + $0xa8] sm:$0xff] %v808_v56  ;;  %v797_v59 = vadd.f32 %v1050_v57, %v1250_v24  ;;  %v813_v60 = vadd.f32 %v1066_v58, %v1250_v24 }
  0xff   : > { %v586_v61 = vpop.f32.mrf.mxu0  ;;  %v650_v62 = vpop.f32.mrf.mxu1 }
 0x100   : > { %829 = vst [vmem:[%s1255_s19 + $0x50] sm:$0xff] %v797_v59  ;;  %845 = vst [vmem:[%s1255_s19 + $0xd0] sm:$0xff] %v813_v60  ;;  %v795_v63 = vadd.f32 %v1250_v24, %v586_v61  ;;  %v811_v0 = vadd.f32 %v1250_v24, %v650_v62 }
 0x101   : > { %v1051_v1 = vpop.f32.mrf.mxu0  ;;  %v1067_v2 = vpop.f32.mrf.mxu1 }
 0x102   : > { %827 = vst [vmem:[%s1255_s19 + $0x40] sm:$0xff] %v795_v63  ;;  %843 = vst [vmem:[%s1255_s19 + $0xc0] sm:$0xff] %v811_v0  ;;  %v798_v3 = vadd.f32 %v1051_v1, %v1250_v24  ;;  %v814_v4 = vadd.f32 %v1067_v2, %v1250_v24 }
 0x103   : > { %v589_v5 = vpop.f32.mrf.mxu0  ;;  %v653_v6 = vpop.f32.mrf.mxu1 }
 0x104   : > { %830 = vst [vmem:[%s1255_s19 + $0x58] sm:$0xff] %v798_v3  ;;  %846 = vst [vmem:[%s1255_s19 + $0xd8] sm:$0xff] %v814_v4  ;;  %v796_v7 = vadd.f32 %v1250_v24, %v589_v5  ;;  %v812_v8 = vadd.f32 %v1250_v24, %v653_v6 }
 0x105   : > { %v1054_v9 = vpop.f32.mrf.mxu0  ;;  %v1070_v10 = vpop.f32.mrf.mxu1 }
 0x106   : > { %828 = vst [vmem:[%s1255_s19 + $0x48] sm:$0xff] %v796_v7  ;;  %844 = vst [vmem:[%s1255_s19 + $0xc8] sm:$0xff] %v812_v8  ;;  %v801_v11 = vadd.f32 %v1054_v9, %v1250_v24  ;;  %v817_v12 = vadd.f32 %v1070_v10, %v1250_v24 }
 0x107   : > { %v602_v13 = vpop.f32.mrf.mxu0  ;;  %v666_v14 = vpop.f32.mrf.mxu1 }
 0x108   : > { %833 = vst [vmem:[%s1255_s19 + $0x70] sm:$0xff] %v801_v11  ;;  %849 = vst [vmem:[%s1255_s19 + $0xf0] sm:$0xff] %v817_v12  ;;  %v799_v15 = vadd.f32 %v1250_v24, %v602_v13  ;;  %v815_v16 = vadd.f32 %v1250_v24, %v666_v14 }
 0x109   : > { %v1055_v17 = vpop.f32.mrf.mxu0  ;;  %v1071_v18 = vpop.f32.mrf.mxu1 }
 0x10a   : > { %831 = vst [vmem:[%s1255_s19 + $0x60] sm:$0xff] %v799_v15  ;;  %847 = vst [vmem:[%s1255_s19 + $0xe0] sm:$0xff] %v815_v16  ;;  %v802_v19 = vadd.f32 %v1055_v17, %v1250_v24  ;;  %v818_v20 = vadd.f32 %v1071_v18, %v1250_v24 }
 0x10b   : > { %v605_v21 = vpop.f32.mrf.mxu0  ;;  %v669_v22 = vpop.f32.mrf.mxu1 }
 0x10c   : > { %834 = vst [vmem:[%s1255_s19 + $0x78] sm:$0xff] %v802_v19  ;;  %850 = vst [vmem:[%s1255_s19 + $0xf8] sm:$0xff] %v818_v20  ;;  %v800_v23 = vadd.f32 %v1250_v24, %v605_v21  ;;  %v816_v25 = vadd.f32 %v1250_v24, %v669_v22 }
 0x10e   : > { %832 = vst [vmem:[%s1255_s19 + $0x68] sm:$0xff] %v800_v23  ;;  %848 = vst [vmem:[%s1255_s19 + $0xe8] sm:$0xff] %v816_v25 }
 0x10f PF: > { %s13_s14 = sadd.s32 1, %s1158_s14   ;;  %s1334_s12 = smov %s1154_s13 }
 0x110   : > { %p10_p5 = scmp.ge.s32.totalorder %s13_s14, 66   ;;  %s1335_s13 = smov %s1337_s15 }
 0x112   :  { %12 = sbr.rel (!%p10_p5) target bundleno = 2 (0x2), region = 76 }

</bundles_post_ra>
